<compile_context>
chip_gen: v7x
topology: tpu7x:2x2x1
jax: 0.10.0
libtpu: 0.0.40
codegen_flags: <defaults>
</compile_context>

<pallas_src>
import functools
import math

import jax
import jax.numpy as jnp
from jax.experimental import pallas as pl
from jax.experimental.pallas import tpu as pltpu


def _sinusoid_kernel(inv_freq_ref, phase_ref, scale_ref, o_ref, *, tile_rows):
    t = pl.program_id(0)
    # Integer row index of every element of this (tile_rows, dim) block.
    rows = jax.lax.broadcasted_iota(jnp.int32, o_ref.shape, 0)
    pos = (rows + t * tile_rows).astype(jnp.float32)
    # First half lanes: pos * inv_freq            -> sin(.)
    # Second half lanes: pos * inv_freq + pi/2    -> sin(.) == cos(pos * inv_freq)
    emb = pos * inv_freq_ref[...] + phase_ref[...]
    o_ref[...] = (jnp.sin(emb) * scale_ref[0]).astype(o_ref.dtype)


def scaled_sinusoidal_embedding(x, scale, inv_freq):
    """x: (B, seq_len, ...) -- only seq_len is used. scale: (1,), inv_freq: (dim//2,)."""
    seq_len = x.shape[1]
    half_dim = inv_freq.shape[0]
    dim = 2 * half_dim

    # Tiny per-lane constants built outside the kernel (one-time, negligible).
    inv_freq_full = jnp.concatenate([inv_freq, inv_freq]).astype(jnp.float32).reshape(1, dim)
    phase = jnp.concatenate(
        [jnp.zeros((half_dim,), jnp.float32),
         jnp.full((half_dim,), math.pi / 2.0, jnp.float32)]).reshape(1, dim)
    scale = scale.astype(jnp.float32).reshape(1)

    # Sequence tile: full length for short sequences, else 512-row tiles
    # (512 * dim * 4B double-buffered stays far under VMEM on all chips).
    tile_rows = seq_len if seq_len <= 512 else 512
    grid = (pl.cdiv(seq_len, tile_rows),)

    kernel = functools.partial(_sinusoid_kernel, tile_rows=tile_rows)

    cost = pl.CostEstimate(
        flops=3 * seq_len * dim,
        transcendentals=seq_len * dim,
        bytes_accessed=seq_len * dim * 4 + 2 * dim * 4 + 4,
    )

    return pl.pallas_call(
        kernel,
        out_shape=jax.ShapeDtypeStruct((seq_len, dim), jnp.float32),
        grid=grid,
        in_specs=[
            pl.BlockSpec((1, dim), lambda t: (0, 0)),               # inv_freq_full
            pl.BlockSpec((1, dim), lambda t: (0, 0)),               # phase
            pl.BlockSpec(memory_space=pltpu.MemorySpace.SMEM),      # scale scalar
        ],
        out_specs=pl.BlockSpec((tile_rows, dim), lambda t: (t, 0)),
        compiler_params=pltpu.CompilerParams(
            dimension_semantics=("parallel",)),
        cost_estimate=cost,
    )(inv_freq_full, phase, scale)


def scaled_sinusoidal_reference(x, scale, inv_freq):
    """Pure-JAX reference of the PyTorch forward (default pos path)."""
    seq_len = x.shape[1]
    pos = jnp.arange(seq_len, dtype=jnp.float32)
    emb = pos[:, None] * inv_freq[None, :].astype(jnp.float32)
    emb = jnp.concatenate([jnp.sin(emb), jnp.cos(emb)], axis=-1)
    return emb * scale.astype(jnp.float32)


if __name__ == "__main__":
    key = jax.random.PRNGKey(0)

    B, N, DIM = 2, 16, 256
    THETA = 10000.0

    # x is only used for its sequence length (matches the PyTorch module).
    x = jax.random.normal(key, (B, N, DIM), jnp.float32)

    half = DIM // 2
    scale = jnp.ones((1,), jnp.float32) * (DIM ** -0.5)          # nn.Parameter init
    freq_seq = jnp.arange(half, dtype=jnp.float32) / half
    inv_freq = THETA ** (-freq_seq)                              # registered buffer

    out = jax.jit(scaled_sinusoidal_embedding)(x, scale, inv_freq)
    out = jax.block_until_ready(out)

    ref = scaled_sinusoidal_reference(x, scale, inv_freq)
    assert out.shape == (N, DIM)
    assert jnp.allclose(out, ref, atol=1e-4, rtol=1e-4), (
        float(jnp.max(jnp.abs(out - ref))))

    print("KERNEL_OK")
</pallas_src>

<mosaic_0001>
module attributes {stable_mosaic.version = 11 : i64} {
  func.func @_sinusoid_kernel(%arg0: i32, %arg1: memref<1x256xf32, #tpu.memory_space<vmem>>, %arg2: memref<1x256xf32, #tpu.memory_space<vmem>>, %arg3: memref<1xf32, #tpu.memory_space<smem>>, %arg4: memref<16x256xf32, #tpu.memory_space<vmem>>) attributes {dimension_semantics = [#tpu.dimension_semantics<parallel>], iteration_bounds = array<i64: 1>, scalar_prefetch = 0 : i64, scratch_operands = 0 : i64, tpu.core_type = #tpu.core_type<tc>, window_params = [{pipeline_mode = #tpu.pipeline_mode<synchronous>, transform_indices = @transform_0, window_bounds = array<i64: 1, 256>}, {pipeline_mode = #tpu.pipeline_mode<synchronous>, transform_indices = @transform_1, window_bounds = array<i64: 1, 256>}, {transform_indices = @transform_2, window_bounds = array<i64: 1>}, {transform_indices = @transform_3, window_bounds = array<i64: 16, 256>}]} {
    %0 = tpu.iota {dimensions = array<i32: 0>} : vector<16x256xi32>
    %c16_i32 = arith.constant 16 : i32
    %1 = arith.muli %arg0, %c16_i32 : i32
    %2 = vector.broadcast %1 : i32 to vector<16x256xi32>
    %3 = arith.addi %0, %2 : vector<16x256xi32>
    %4 = arith.sitofp %3 : vector<16x256xi32> to vector<16x256xf32>
    %c0 = arith.constant 0 : index
    %c0_0 = arith.constant 0 : index
    %5 = vector.load %arg1[%c0, %c0_0] : memref<1x256xf32, #tpu.memory_space<vmem>>, vector<1x256xf32>
    %6 = vector.broadcast %5 : vector<1x256xf32> to vector<16x256xf32>
    %7 = arith.mulf %4, %6 : vector<16x256xf32>
    %c0_1 = arith.constant 0 : index
    %c0_2 = arith.constant 0 : index
    %8 = vector.load %arg2[%c0_1, %c0_2] : memref<1x256xf32, #tpu.memory_space<vmem>>, vector<1x256xf32>
    %9 = vector.broadcast %8 : vector<1x256xf32> to vector<16x256xf32>
    %10 = arith.addf %7, %9 : vector<16x256xf32>
    %11 = math.sin %10 : vector<16x256xf32>
    %c0_3 = arith.constant 0 : index
    %12 = memref.load %arg3[%c0_3] : memref<1xf32, #tpu.memory_space<smem>>
    %13 = vector.broadcast %12 : f32 to vector<16x256xf32>
    %14 = arith.mulf %11, %13 : vector<16x256xf32>
    %c0_4 = arith.constant 0 : index
    %c0_5 = arith.constant 0 : index
    %15 = vector.load %arg4[%c0_4, %c0_5] : memref<16x256xf32, #tpu.memory_space<vmem>>, vector<16x256xf32>
    tpu.vector_store %arg4[%c0_4, %c0_5], %14 {strides = array<i32>} : memref<16x256xf32, #tpu.memory_space<vmem>>, vector<16x256xf32>,
    return
  }
  func.func @transform_0(%arg0: i32) -> (i32, i32) {
    %c0_i32 = arith.constant 0 : i32
    %c0_i32_0 = arith.constant 0 : i32
    %c0_i32_1 = arith.constant 0 : i32
    return %c0_i32, %c0_i32_0 : i32, i32
  }
  func.func @transform_1(%arg0: i32) -> (i32, i32) {
    %c0_i32 = arith.constant 0 : i32
    %c0_i32_0 = arith.constant 0 : i32
    %c0_i32_1 = arith.constant 0 : i32
    return %c0_i32, %c0_i32_0 : i32, i32
  }
  func.func @transform_2(%arg0: i32) -> i32 {
    %c0_i32 = arith.constant 0 : i32
    %c0_i32_0 = arith.constant 0 : i32
    return %c0_i32 : i32
  }
  func.func @transform_3(%arg0: i32) -> (i32, i32) {
    %c0_i32 = arith.constant 0 : i32
    %c0_i32_0 = arith.constant 0 : i32
    return %arg0, %c0_i32 : i32, i32
  }
}

</mosaic_0001>

<bundles_post_ra>
// kernel: scaled_sinusoidal_embedding.1
= control target key start
LH: loop header
LB: loop body
LE: loop exit
PB: predicated region body
PF: predicated region fallthrough
CT: control target
= control target key end

     0   :  { %9 = vsyncpa [#allocation4], 0  ;;  %v16_v0 = vlaneseq  ;;  %v580_v48 = vmov 683565275   ;;  %v581_v50 = vmov 2475754826   ;;  %s948_s0 = inlined_call_operand.vmem [shape: f32[1,256], index: 0, kind: input, shape index: {}]   ;;  %s949_s1 = inlined_call_operand.vmem [shape: f32[1,256], index: 1, kind: input, shape index: {}]   ;;  %s950_s2 = inlined_call_operand.<no memory space> [shape: f32[1], index: 2, kind: input, shape index: {}]   ;;  %s951_s3 = inlined_call_operand.hbm [shape: f32[16,256], index: 3, kind: output, shape index: {}]  }
   0x1   :  { %v25_v2 = vld [vmem:[%s948_s0] sm:$0x3]  ;;  %v582_v52 = vmov 2131351028   ;;  %v583_v54 = vmov 2102212464  }
   0x2   :  { %v17_v1 = vshrl.u32 %v16_v0, 7  ;;  %v41_v3 = vld [vmem:[%s949_s1] sm:$0x3]  ;;  %v584_v56 = vmov 920167782  }
   0x3   :  { %v585_v0 = vmov 1326507024  }
   0x4   :  { %v18_v4 = vadd.s32 8, %v17_v1  ;;  %v23_v5 = vcvt.s32.f32 %v17_v1  ;;  %v29_v6 = vsub.s32 0, %v17_v1  ;;  %v33_v7 = vsub.s32 1, %v17_v1 }
   0x6   :  { %v24_v8 = vcvt.s32.f32 %v18_v4  ;;  %v30_v9 = vrot.slane %v25_v2, %v29_v6  ;;  %v34_v10 = vrot.slane %v25_v2, %v33_v7  ;;  %v46_v11 = vrot.slane %v41_v3, %v29_v6 }
   0x7   :  { %v615_v12 = vrot.slane %v41_v3, %v33_v7 }
   0x8   :  { %v37_v13 = vmul.f32 %v30_v9, %v23_v5  ;;  %v38_v14 = vmul.f32 %v34_v10, %v23_v5  ;;  %v39_v15 = vmul.f32 %v30_v9, %v24_v8  ;;  %v634_v37 = vmul.f32 %v34_v10, %v24_v8 }
   0xa   :  { %v617_v16 = vadd.f32 %v46_v11, %v37_v13  ;;  %v620_v17 = vadd.f32 %v615_v12, %v38_v14  ;;  %v622_v18 = vadd.f32 %v46_v11, %v39_v15 }
   0xc   :  { %v57_v19 = vand.u32 2147483647, %v617_v16  ;;  %v60_v20 = vand.u32 2139095040, %v617_v16  ;;  %v161_v21 = vand.u32 2147483647, %v620_v17  ;;  %v164_v22 = vand.u32 2139095040, %v620_v17 }
   0xd   :  { %v268_v27 = vand.u32 2139095040, %v622_v18  ;;  %v265_v35 = vand.u32 2147483647, %v622_v18  ;;  %vm59_vm13 = vcmp.lt.s32.totalorder %v617_v16, 0 }
   0xe   :  { %v61_v23 = vshrl.u32 %v60_v20, 23  ;;  %v64_v24 = vand.u32 8388607, %v57_v19  ;;  %v165_v25 = vshrl.u32 %v164_v22, 23  ;;  %v168_v26 = vand.u32 8388607, %v161_v21 }
   0xf   :  { %v269_v30 = vshrl.u32 %v268_v27, 23  ;;  %v642_v45 = vand.u32 8388607, %v265_v35  ;;  %vm752_vm15 = vcmp.le.f32.partialorder %v57_v19, 0.7853982 }
  0x10   :  { %v499_v28 = vadd.s32 4294967169, %v61_v23  ;;  %v503_v29 = vadd.s32 4294967169, %v165_v25  ;;  %v65_v31 = vor.u32 8388608, %v64_v24  ;;  %v169_v33 = vor.u32 8388608, %v168_v26 }
  0x11   :  { %v507_v36 = vadd.s32 4294967169, %v269_v30 }
  0x12   :  { %v67_v32 = vadd.s32 1, %v499_v28  ;;  %v171_v34 = vadd.s32 1, %v503_v29  ;;  %v636_v41 = vshll.u32 %v65_v31, 8  ;;  %v638_v44 = vshll.u32 %v169_v33, 8 }
  0x13   :  { %v644_v46 = vadd.s32 1, %v507_v36 }
  0x14   :  { %vm68_vm0 = vcmp.gt.s32.totalorder %v67_v32, 0  ;;  %vm172_vm1 = vcmp.gt.s32.totalorder %v171_v34, 0 }
  0x15   :  { %v69_v38 = vsel %vm68_vm0, %v67_v32, 0  ;;  %v173_v42 = vsel %vm172_vm1, %v171_v34, 0  ;;  %vm276_vm6 = vcmp.gt.s32.totalorder %v644_v46, 0 }
  0x16   :  { %v70_v39 = vshrl.u32 %v69_v38, 5  ;;  %v71_v40 = vand.u32 31, %v69_v38  ;;  %v175_v43 = vand.u32 31, %v173_v42  ;;  %v651_v58 = vshrl.u32 %v173_v42, 5 }
  0x18   :  { %v72_v47 = vsub.s32 32, %v71_v40  ;;  %v74_v49 = vshll.u32 %v580_v48, %v71_v40  ;;  %v77_v51 = vshll.u32 %v581_v50, %v71_v40  ;;  %v80_v53 = vshll.u32 %v582_v52, %v71_v40 }
  0x19   :  { %v83_v55 = vshll.u32 %v583_v54, %v71_v40  ;;  %v86_v57 = vshll.u32 %v584_v56, %v71_v40  ;;  %vm89_vm2 = vcmp.lt.s32.totalorder %v70_v39, 1  ;;  %vm90_vm3 = vcmp.lt.s32.totalorder %v70_v39, 2 }
  0x1a   :  { %v73_v59 = vshrl.u32 %v580_v48, %v72_v47  ;;  %v75_v60 = vshrl.u32 %v581_v50, %v72_v47  ;;  %v78_v61 = vshrl.u32 %v582_v52, %v72_v47  ;;  %v81_v62 = vshrl.u32 %v583_v54, %v72_v47 }
  0x1b   :  { %v84_v63 = vshrl.u32 %v584_v56, %v72_v47  ;;  %v87_v1 = vshrl.u32 %v585_v0, %v72_v47  ;;  %vm92_vm4 = vcmp.lt.s32.totalorder %v70_v39, 4  ;;  %v176_v5 = vsub.s32 32, %v175_v43 }
  0x1c   :  { %v76_v2 = vor.u32 %v75_v60, %v74_v49  ;;  %v79_v3 = vor.u32 %v78_v61, %v77_v51  ;;  %v82_v4 = vor.u32 %v81_v62, %v80_v53  ;;  %vm91_vm5 = vcmp.lt.s32.totalorder %v70_v39, 3 }
  0x1d   :  { %v85_v6 = vor.u32 %v84_v63, %v83_v55  ;;  %v88_v7 = vor.u32 %v87_v1, %v86_v57  ;;  %v178_v8 = vshll.u32 %v580_v48, %v175_v43  ;;  %v181_v22 = vshll.u32 %v581_v50, %v175_v43 }
  0x1e   :  { %v93_v9 = vsel %vm89_vm2, %v73_v59, %v76_v2  ;;  %v94_v10 = vsel %vm92_vm4, %v82_v4, 2102212464  ;;  %v97_v11 = vsel %vm89_vm2, %v76_v2, %v79_v3  ;;  %v101_v13 = vsel %vm89_vm2, %v79_v3, %v82_v4 }
  0x1f   :  { %v95_v14 = vsel %vm91_vm5, %v79_v3, %v94_v10  ;;  %v98_v15 = vsel %vm92_vm4, %v85_v6, 920167782  ;;  %v102_v20 = vsel %vm92_vm4, %v88_v7, 1326507024  ;;  %v177_v25 = vshrl.u32 %v580_v48, %v176_v5 }
  0x20   :  { %v99_v23 = vsel %vm91_vm5, %v82_v4, %v98_v15  ;;  %v103_v24 = vsel %vm91_vm5, %v85_v6, %v102_v20  ;;  %v179_v26 = vshrl.u32 %v581_v50, %v176_v5  ;;  %v96_v27 = vsel %vm90_vm3, %v93_v9, %v95_v14 }
  0x21   :  { %v100_v28 = vsel %vm90_vm3, %v97_v11, %v99_v23  ;;  %v104_v29 = vsel %vm90_vm3, %v101_v13, %v103_v24  ;;  %v182_v30 = vshrl.u32 %v582_v52, %v176_v5  ;;  %v184_v40 = vshll.u32 %v582_v52, %v175_v43 }
  0x22   :  { %v672_v31 = vmul.u32.u64.low %v636_v41, %v104_v29  ;;  %v673_v32 = vmul.u32.u64.high %v636_v41, %v104_v29, %v672_v31  ;;  %v676_v33 = vmul.u32.u64.low %v636_v41, %v100_v28  ;;  %v677_v34 = vmul.u32.u64.high %v636_v41, %v100_v28, %v676_v33 }
  0x23   :  { %v180_v36 = vor.u32 %v179_v26, %v178_v8  ;;  %v183_v38 = vor.u32 %v182_v30, %v181_v22  ;;  %v185_v42 = vshrl.u32 %v583_v54, %v176_v5  ;;  %v187_v39 = vshll.u32 %v583_v54, %v175_v43 }
  0x24   :  { %v188_v47 = vshrl.u32 %v584_v56, %v176_v5  ;;  %v190_v49 = vshll.u32 %v584_v56, %v175_v43  ;;  %v191_v51 = vshrl.u32 %v585_v0, %v176_v5  ;;  %v112_v53 = vmul.u32 %v636_v41, %v96_v27 }
  0x25   :  { %v186_v55 = vor.u32 %v185_v42, %v184_v40  ;;  %vm193_vm7 = vcmp.lt.s32.totalorder %v651_v58, 1  ;;  %vm194_vm8 = vcmp.lt.s32.totalorder %v651_v58, 2  ;;  %vm114_vm9 = vc.u32 %v673_v32, %v676_v33 }
  0x26   :  { %v115_v57 = vadd.s32 1, %v677_v34  ;;  %v189_v59 = vor.u32 %v188_v47, %v187_v39  ;;  %vm195_vm10 = vcmp.lt.s32.totalorder %v651_v58, 3  ;;  %v192_v60 = vor.u32 %v191_v51, %v190_v49 }
  0x27   :  { %vm196_vm11 = vcmp.lt.s32.totalorder %v651_v58, 4  ;;  %v197_v43 = vsel %vm193_vm7, %v177_v25, %v180_v36  ;;  %v201_v61 = vsel %vm193_vm7, %v180_v36, %v183_v38  ;;  %v205_v1 = vsel %vm193_vm7, %v183_v38, %v186_v55 }
  0x28   :  { %v116_v41 = vsel %vm114_vm9, %v115_v57, %v677_v34  ;;  %v198_v62 = vsel %vm196_vm11, %v186_v55, 2102212464  ;;  %v202_v63 = vsel %vm196_vm11, %v189_v59, 920167782  ;;  %v206_v5 = vsel %vm196_vm11, %v192_v60, 1326507024 }
  0x29   :  { %v117_v2 = vadd.s32 %v116_v41, %v112_v53  ;;  %v199_v3 = vsel %vm195_vm10, %v183_v38, %v198_v62  ;;  %v203_v4 = vsel %vm195_vm10, %v186_v55, %v202_v63  ;;  %v207_v8 = vsel %vm195_vm10, %v189_v59, %v206_v5 }
  0x2a   :  { %v200_v6 = vsel %vm194_vm8, %v197_v43, %v199_v3  ;;  %v204_v7 = vsel %vm194_vm8, %v201_v61, %v203_v4  ;;  %v277_v9 = vsel %vm276_vm6, %v644_v46, 0  ;;  %v208_v11 = vsel %vm194_vm8, %v205_v1, %v207_v8 }
  0x2b   :  { %v118_v10 = vadd.s32 536870912, %v117_v2  ;;  %v705_v13 = vmul.u32.u64.low %v638_v44, %v204_v7  ;;  %v706_v14 = vmul.u32.u64.high %v638_v44, %v204_v7, %v705_v13  ;;  %v711_v15 = vadd.f32 %v615_v12, %v634_v37 }
  0x2c   :  { %v714_v20 = vmul.u32.u64.low %v638_v44, %v208_v11  ;;  %v715_v22 = vmul.u32.u64.high %v638_v44, %v208_v11, %v714_v20  ;;  %v273_v46 = vor.u32 8388608, %v642_v45  ;;  %v279_v24 = vand.u32 31, %v277_v9 }
  0x2d   :  { %v119_v23 = vshrl.u32 %v118_v10, 30  ;;  %v216_v58 = vmul.u32 %v638_v44, %v200_v6  ;;  %v219_v26 = vadd.s32 1, %v706_v14  ;;  %v369_v12 = vand.u32 2147483647, %v711_v15 }
  0x2e   :  { %v280_v27 = vsub.s32 32, %v279_v24  ;;  %vm218_vm12 = vc.u32 %v715_v22, %v705_v13  ;;  %v372_v37 = vand.u32 2139095040, %v711_v15  ;;  %v728_v29 = vshrl.u32 %v277_v9, 5 }
  0x2f   :  { %v120_v25 = vshll.u32 %v119_v23, 30  ;;  %v220_v45 = vsel %vm218_vm12, %v219_v26, %v706_v14  ;;  %v730_v44 = vshll.u32 %v273_v46, 8  ;;  %v282_v31 = vshll.u32 %v580_v48, %v279_v24 }
  0x30   :  { %v221_v30 = vadd.s32 %v220_v45, %v216_v58  ;;  %v283_v34 = vshrl.u32 %v581_v50, %v280_v27  ;;  %v285_v36 = vshll.u32 %v581_v50, %v279_v24  ;;  %v286_v40 = vshrl.u32 %v582_v52, %v280_v27 }
  0x31   :  { %v725_v28 = vsub.s32 %v117_v2, %v120_v25  ;;  %v288_v42 = vshll.u32 %v582_v52, %v279_v24  ;;  %v289_v39 = vshrl.u32 %v583_v54, %v280_v27  ;;  %v113_v47 = vadd.s32 %v676_v33, %v673_v32 }
  0x32   :  { %v222_v49 = vadd.s32 536870912, %v221_v30  ;;  %v291_v51 = vshll.u32 %v583_v54, %v279_v24  ;;  %v373_v53 = vshrl.u32 %v372_v37, 23  ;;  %v143_v57 = vsub.s32 4, %v119_v23 }
  0x33   :  { %v123_v38 = vsub.s32 0, %v725_v28  ;;  %v292_v59 = vshrl.u32 %v584_v56, %v280_v27  ;;  %vm300_vm14 = vcmp.lt.s32.totalorder %v728_v29, 4  ;;  %v281_v43 = vshrl.u32 %v580_v48, %v280_v27 }
  0x34   :  { %v745_v60 = vshrl.u32 %v222_v49, 30  ;;  %v294_v61 = vshll.u32 %v584_v56, %v279_v24  ;;  %v295_v41 = vshrl.u32 %v585_v0, %v280_v27  ;;  %v284_v62 = vor.u32 %v283_v34, %v282_v31 }
  0x35   :  { %v500_v55 = vmin.u32 %v123_v38, %v725_v28  ;;  %v287_v63 = vor.u32 %v286_v40, %v285_v36  ;;  %v290_v1 = vor.u32 %v289_v39, %v288_v42  ;;  %v293_v3 = vor.u32 %v292_v59, %v291_v51 }
  0x36   :  { %v224_v2 = vshll.u32 %v745_v60, 30  ;;  %vm297_vm0 = vcmp.lt.s32.totalorder %v728_v29, 1  ;;  %vm299_vm1 = vcmp.lt.s32.totalorder %v728_v29, 3  ;;  %v296_v5 = vor.u32 %v295_v41, %v294_v61 }
  0x37   :  { %v125_v33 = vclz %v500_v55  ;;  %v302_v6 = vsel %vm300_vm14, %v290_v1, 2102212464  ;;  %v511_v19 = vadd.s32 4294967169, %v373_v53  ;;  %v144_v7 = vsel %vm59_vm13, %v143_v57, %v119_v23 }
  0x38   :  { %v763_v8 = vsub.s32 %v221_v30, %v224_v2  ;;  %vm298_vm2 = vcmp.lt.s32.totalorder %v728_v29, 2  ;;  %v306_v9 = vsel %vm300_vm14, %v293_v3, 920167782  ;;  %v301_v10 = vsel %vm297_vm0, %v281_v43, %v284_v62 }
  0x39   :  { %v501_v4 = vadd.s32 4294967294, %v125_v33  ;;  %v305_v11 = vsel %vm297_vm0, %v284_v62, %v287_v63  ;;  %v307_v14 = vsel %vm299_vm1, %v290_v1, %v306_v9  ;;  %v303_v46 = vsel %vm299_vm1, %v287_v63, %v302_v6 }
  0x3a   :  { %v227_v23 = vsub.s32 0, %v763_v8  ;;  %v309_v24 = vsel %vm297_vm0, %v287_v63, %v290_v1  ;;  %v310_v27 = vsel %vm300_vm14, %v296_v5, 1326507024  ;;  %v308_v45 = vsel %vm298_vm2, %v305_v11, %v307_v14 }
  0x3b   :  { %vm502_vm3 = vcmp.lt.s32.totalorder %v501_v4, 0  ;;  %v311_v30 = vsel %vm299_vm1, %v293_v3, %v310_v27  ;;  %v789_v31 = vand.u32 8388607, %v369_v12  ;;  %v379_v38 = vadd.s32 1, %v511_v19 }
  0x3c   :  { %v128_v20 = vsel %vm502_vm3, 0, %v501_v4  ;;  %v504_v37 = vmin.u32 %v227_v23, %v763_v8  ;;  %v146_v40 = vsel %vm752_vm15, 0, %v144_v7  ;;  %v304_v39 = vsel %vm298_vm2, %v301_v10, %v303_v46 }
  0x3d   :  { %v129_v58 = vsub.s32 32, %v128_v20  ;;  %v130_v25 = vshll.u32 %v725_v28, %v128_v20  ;;  %v133_v26 = vsub.s32 4294967266, %v128_v20  ;;  %v312_v28 = vsel %vm298_vm2, %v309_v24, %v311_v30 }
  0x3e   :  { %v229_v42 = vclz %v504_v37  ;;  %v798_v53 = vmul.u32.u64.low %v730_v44, %v312_v28  ;;  %v799_v55 = vmul.u32.u64.high %v730_v44, %v312_v28, %v798_v53  ;;  %vm380_vm4 = vcmp.gt.s32.totalorder %v379_v38, 0 }
  0x3f   :  { %v131_v34 = vshrl.u32 %v113_v47, %v129_v58  ;;  %v134_v36 = vadd.s32 127, %v133_v26  ;;  %v802_v47 = vmul.u32.u64.low %v730_v44, %v308_v45  ;;  %v803_v59 = vmul.u32.u64.high %v730_v44, %v308_v45, %v802_v47 }
  0x40   :  { %v505_v57 = vadd.s32 4294967294, %v229_v42  ;;  %v377_v41 = vor.u32 8388608, %v789_v31  ;;  %v381_v33 = vsel %vm380_vm4, %v379_v38, 0  ;;  %v807_v29 = vadd.s32 3, %v146_v40 }
  0x41   :  { %v132_v49 = vor.u32 %v131_v34, %v130_v25  ;;  %v135_v51 = vshll.u32 %v134_v36, 23  ;;  %v217_v62 = vadd.s32 %v705_v13, %v715_v22  ;;  %v383_v63 = vand.u32 31, %v381_v33 }
  0x42   :  { %vm506_vm5 = vcmp.lt.s32.totalorder %v505_v57, 0  ;;  %v320_v3 = vmul.u32 %v730_v44, %v304_v39  ;;  %vm322_vm6 = vc.u32 %v799_v55, %v802_v47  ;;  %vm163_vm7 = vcmp.lt.s32.totalorder %v620_v17, 0 }
  0x43   :  { %v136_v43 = vor.u32 4788187, %v135_v51  ;;  %v139_v61 = vcvt.s32.f32 %v132_v49  ;;  %v232_v2 = vsel %vm506_vm5, 0, %v505_v57  ;;  %v323_v19 = vadd.s32 1, %v803_v59 }
  0x44   :  { %v233_v4 = vsub.s32 32, %v232_v2  ;;  %v234_v5 = vshll.u32 %v763_v8, %v232_v2  ;;  %v237_v6 = vsub.s32 4294967266, %v232_v2  ;;  %v247_v13 = vsub.s32 4, %v745_v60 }
  0x45   :  { %v137_v1 = vand.u32 2147483647, %v136_v43  ;;  %v818_v22 = vshrl.u32 %v381_v33, 5  ;;  %v384_v9 = vsub.s32 32, %v383_v63  ;;  %v324_v44 = vsel %vm322_vm6, %v323_v19, %v803_v59 }
  0x46   :  { %v235_v10 = vshrl.u32 %v217_v62, %v233_v4  ;;  %v238_v11 = vadd.s32 127, %v237_v6  ;;  %v386_v14 = vshll.u32 %v580_v48, %v383_v63  ;;  %v325_v23 = vadd.s32 %v324_v44, %v320_v3 }
  0x47   :  { %v140_v7 = vmul.f32 %v139_v61, %v137_v1  ;;  %v387_v46 = vshrl.u32 %v581_v50, %v384_v9  ;;  %v389_v8 = vshll.u32 %v581_v50, %v383_v63  ;;  %vm826_vm8 = vcmp.le.f32.partialorder %v161_v21, 0.7853982 }
  0x48   :  { %v236_v58 = vor.u32 %v235_v10, %v234_v5  ;;  %v239_v25 = vshll.u32 %v238_v11, 23  ;;  %v390_v26 = vshrl.u32 %v582_v52, %v384_v9  ;;  %v392_v27 = vshll.u32 %v582_v52, %v383_v63 }
  0x49   :  { %v141_v20 = vxor.u32 2147483648, %v140_v7  ;;  %v326_v45 = vadd.s32 536870912, %v325_v23  ;;  %v393_v30 = vshrl.u32 %v583_v54, %v384_v9  ;;  %v395_v50 = vshll.u32 %v583_v54, %v383_v63 }
  0x4a   :  { %v240_v31 = vor.u32 4788187, %v239_v25  ;;  %v243_v34 = vcvt.s32.f32 %v236_v58  ;;  %v388_v36 = vor.u32 %v387_v46, %v386_v14  ;;  %v391_v38 = vor.u32 %v390_v26, %v389_v8 }
  0x4b   :  { %v142_v37 = vsel %vm59_vm13, %v141_v20, %v140_v7  ;;  %v839_v28 = vshrl.u32 %v326_v45, 30  ;;  %v396_v52 = vshrl.u32 %v584_v56, %v384_v9  ;;  %v398_v42 = vshll.u32 %v584_v56, %v383_v63 }
  0x4c   :  { %v145_v21 = vsel %vm752_vm15, %v617_v16, %v142_v37  ;;  %v241_v40 = vand.u32 2147483647, %v240_v31  ;;  %v399_v39 = vshrl.u32 %v585_v0, %v384_v9  ;;  %v248_v54 = vsel %vm163_vm7, %v247_v13, %v745_v60 }
  0x4d   :  { %540 = vcosq.f32 %v145_v21  ;;  %v328_v32 = vshll.u32 %v839_v28, 30  ;;  %v397_v49 = vor.u32 %v396_v52, %v395_v50  ;;  %vm401_vm9 = vcmp.lt.s32.totalorder %v818_v22, 1 }
  0x4e   :  { %542 = vsinq.f32 %v145_v21  ;;  %v244_v51 = vmul.f32 %v243_v34, %v241_v40  ;;  %v385_v53 = vshrl.u32 %v580_v48, %v384_v9  ;;  %v394_v57 = vor.u32 %v393_v30, %v392_v27 }
  0x4f   :  { %v850_v59 = vshll.u32 %v377_v41, 8  ;;  %v852_v43 = vsub.s32 %v325_v23, %v328_v32  ;;  %v400_v56 = vor.u32 %v399_v39, %v398_v42  ;;  %vm403_vm10 = vcmp.lt.s32.totalorder %v818_v22, 3 }
  0x50   :  { %vm404_vm11 = vcmp.lt.s32.totalorder %v818_v22, 4  ;;  %vm149_vm12 = vweird.f32 %v617_v16  ;;  %v245_v0 = vxor.u32 2147483648, %v244_v51  ;;  %vm402_vm13 = vcmp.lt.s32.totalorder %v818_v22, 2 }
  0x51   :  { %v406_v60 = vsel %vm404_vm11, %v394_v57, 2102212464  ;;  %v409_v48 = vsel %vm401_vm9, %v388_v36, %v391_v38  ;;  %v151_v61 = vand.u32 3, %v807_v29  ;;  %v250_v41 = vsel %vm826_vm8, 0, %v248_v54 }
  0x52   :  { %v331_v33 = vsub.s32 0, %v852_v43  ;;  %v410_v62 = vsel %vm404_vm11, %v397_v49, 920167782  ;;  %v246_v63 = vsel %vm163_vm7, %v245_v0, %v244_v51  ;;  %v405_v1 = vsel %vm401_vm9, %v385_v53, %v388_v36 }
  0x53   :  { %v407_v2 = vsel %vm403_vm10, %v391_v38, %v406_v60  ;;  %v411_v29 = vsel %vm403_vm10, %v394_v57, %v410_v62  ;;  %v249_v3 = vsel %vm826_vm8, %v620_v17, %v246_v63  ;;  %v413_v6 = vsel %vm401_vm9, %v391_v38, %v394_v57 }
  0x54   :  { %v508_v4 = vmin.u32 %v331_v33, %v852_v43  ;;  %v412_v5 = vsel %vm402_vm13, %v409_v48, %v411_v29  ;;  %544 = vcosq.f32 %v249_v3  ;;  %v414_v19 = vsel %vm404_vm11, %v400_v56, 1326507024 }
  0x55   :  { %v887_v7 = vmul.u32.u64.low %v850_v59, %v412_v5  ;;  %v888_v13 = vmul.u32.u64.high %v850_v59, %v412_v5, %v887_v7  ;;  %vm152_vm14 = vcmp.lt.s32.totalorder %v151_v61, 2  ;;  %vm156_vm15 = vcmp.eq.s32.totalorder %v151_v61, 2 }
  0x56   :  { %546 = vsinq.f32 %v249_v3  ;;  %v333_v10 = vclz %v508_v4  ;;  %vm153_vm0 = vcmp.eq.s32.totalorder %v151_v61, 0  ;;  %v254_v14 = vadd.s32 3, %v250_v41 }
  0x57   :  { %v541_v9 = vpop.eup %540  ;;  %v415_v20 = vsel %vm403_vm10, %v397_v49, %v414_v19  ;;  %v408_v8 = vsel %vm402_vm13, %v405_v1, %v407_v2  ;;  %v321_v25 = vadd.s32 %v802_v47, %v799_v55  ;;  %v427_v45 = vadd.s32 1, %v888_v13 }
  0x58   :  { %v543_v11 = vpop.eup %542  ;;  %v157_v44 = vxor.u32 2147483648, %v541_v9  ;;  %v509_v46 = vadd.s32 4294967294, %v333_v10  ;;  %v416_v24 = vsel %vm402_vm13, %v413_v6, %v415_v20  ;;  %v907_v30 = vstv %s950_s2  ;;  %s586_s2 = smov [#allocation3]  }
  0x59   :  { %v154_v23 = vxor.u32 2147483648, %v543_v11  ;;  %v900_v26 = vmul.u32.u64.low %v850_v59, %v416_v24  ;;  %v901_v27 = vmul.u32.u64.high %v850_v59, %v416_v24, %v900_v26  ;;  %v255_v50 = vand.u32 3, %v254_v14  ;;  %s488_s16 = sshll.u32 %s586_s2, 4  ;;  %s489_s16 = int_to_ptr.vmem [resolvable:$true] %s488_s16 }
  0x5a   :  { %v158_v58 = vsel %vm156_vm15, %v157_v44, %v543_v11  ;;  %vm510_vm1 = vcmp.lt.s32.totalorder %v509_v46, 0  ;;  %v424_v31 = vmul.u32 %v850_v59, %v408_v8  ;;  %vm253_vm6 = vweird.f32 %v620_v17  ;;  %s556_s17 = scalar_lea.vmem %s489_s16, 512  ;;  %p561_p1 = scmp.lt.s32.totalorder %s489_s16, %s489_s16 }
  0x5b   :  { %v155_v37 = vsel %vm153_vm0, %v541_v9, %v154_v23  ;;  %v336_v21 = vsel %vm510_vm1, 0, %v509_v46  ;;  %vm426_vm2 = vc.u32 %v901_v27, %v887_v7  ;;  %vm260_vm3 = vcmp.eq.s32.totalorder %v255_v50, 2  ;;  %p557_p0 = scmp.ne.s32.totalorder %s489_s16, %s556_s17  ;;  %p562_p2 = scmp.lt.s32.totalorder %s556_s17, %s556_s17 }
  0x5c   :  { %v159_v22 = vsel %vm152_vm14, %v155_v37, %v158_v58  ;;  %v337_v47 = vsub.s32 32, %v336_v21  ;;  %v338_v34 = vshll.u32 %v852_v43, %v336_v21  ;;  %v341_v36 = vsub.s32 4294967266, %v336_v21 }
  0x5d   :  { %v160_v55 = vsel %vm149_vm12, nan, %v159_v22  ;;  %v428_v42 = vsel %vm426_vm2, %v427_v45, %v888_v13  ;;  %vm257_vm4 = vcmp.eq.s32.totalorder %v255_v50, 0  ;;  %vm256_vm5 = vcmp.lt.s32.totalorder %v255_v50, 2  ;;  %p563_p3 = por %p562_p2, %p561_p1 }
  0x5e   :  { %v475_v38 = vmul.f32 %v907_v30, %v160_v55  ;;  %v339_v52 = vshrl.u32 %v321_v25, %v337_v47  ;;  %v342_v40 = vadd.s32 127, %v341_v36  ;;  %v545_v39 = vpop.eup %544  ;;  %v429_v54 = vadd.s32 %v428_v42, %v424_v31 }
  0x5f   :  { %v261_v16 = vxor.u32 2147483648, %v545_v39  ;;  %v351_v41 = vsub.s32 4, %v839_v28  ;;  %vm267_vm7 = vcmp.lt.s32.totalorder %v622_v18, 0  ;;  %vm266_vm8 = vcmp.le.f32.partialorder %v265_v35, 0.7853982  ;;  %p564_p4 = pnand %p563_p3, %p557_p0 }
  0x60   :  { %479 = vst [vmem:[#allocation3] sm:$0xff] %v475_v38  ;;  %v547_v32 = vpop.eup %546  ;;  %v340_v49 = vor.u32 %v339_v52, %v338_v34  ;;  %v343_v51 = vshll.u32 %v342_v40, 23  ;;  %v430_v57 = vadd.s32 536870912, %v429_v54  ;;  %v425_v11 = vadd.s32 %v887_v7, %v901_v27 }
  0x61   :  { %v258_v53 = vxor.u32 2147483648, %v547_v32  ;;  %v262_v59 = vsel %vm260_vm3, %v261_v16, %v547_v32  ;;  %v352_v29 = vsel %vm267_vm7, %v351_v41, %v839_v28  ;;  %vm357_vm13 = vweird.f32 %v622_v18 }
  0x62   :  { %v344_v43 = vor.u32 4788187, %v343_v51  ;;  %v347_v56 = vcvt.s32.f32 %v340_v49  ;;  %v431_v60 = vshrl.u32 %v430_v57, 30  ;;  %v354_v6 = vsel %vm266_vm8, 0, %v352_v29 }
  0x63   :  { %v259_v0 = vsel %vm257_vm4, %v545_v39, %v258_v53  ;;  %v358_v9 = vadd.s32 3, %v354_v6  ;;  %vm371_vm14 = vcmp.lt.s32.totalorder %v711_v15, 0  ;;  %vm370_vm15 = vcmp.le.f32.partialorder %v369_v12, 0.7853982 }
  0x64   :  { %v263_v48 = vsel %vm256_vm5, %v259_v0, %v262_v59  ;;  %v345_v61 = vand.u32 2147483647, %v344_v43  ;;  %v432_v62 = vshll.u32 %v431_v60, 30  ;;  %v455_v31 = vsub.s32 4, %v431_v60 }
  0x65   :  { %v264_v33 = vsel %vm253_vm6, nan, %v263_v48  ;;  %v359_v35 = vand.u32 3, %v358_v9  ;;  %vm461_vm3 = vweird.f32 %v711_v15 }
  0x66   :  { %v348_v63 = vmul.f32 %v347_v56, %v345_v61  ;;  %v476_v1 = vmul.f32 %v907_v30, %v264_v33  ;;  %v433_v2 = vsub.s32 %v429_v54, %v432_v62  ;;  %v456_v38 = vsel %vm371_vm14, %v455_v31, %v431_v60 }
  0x67   :  { %vm364_vm10 = vcmp.eq.s32.totalorder %v359_v35, 2  ;;  %vm361_vm11 = vcmp.eq.s32.totalorder %v359_v35, 0  ;;  %vm360_vm12 = vcmp.lt.s32.totalorder %v359_v35, 2  ;;  %v458_v40 = vsel %vm370_vm15, 0, %v456_v38 }
  0x68   :  { %v349_v17 = vxor.u32 2147483648, %v348_v63  ;;  %480 = vst [vmem:[#allocation3 + $0x8] sm:$0xff] %v476_v1  ;;  %v435_v3 = vsub.s32 0, %v433_v2  ;;  %v462_v42 = vadd.s32 3, %v458_v40 }
  0x6a   :  { %v350_v4 = vsel %vm267_vm7, %v349_v17, %v348_v63  ;;  %v512_v19 = vmin.u32 %v435_v3, %v433_v2  ;;  %v463_v39 = vand.u32 3, %v462_v42 }
  0x6b   :  { %v353_v5 = vsel %vm266_vm8, %v622_v18, %v350_v4 }
  0x6c   :  { %548 = vcosq.f32 %v353_v5  ;;  %v437_v13 = vclz %v512_v19  ;;  %vm468_vm0 = vcmp.eq.s32.totalorder %v463_v39, 2  ;;  %vm465_vm1 = vcmp.eq.s32.totalorder %v463_v39, 0 }
  0x6d   :  { %550 = vsinq.f32 %v353_v5  ;;  %vm464_vm2 = vcmp.lt.s32.totalorder %v463_v39, 2 }
  0x6e   :  { %v513_v10 = vadd.s32 4294967294, %v437_v13 }
  0x70   :  { %vm514_vm9 = vcmp.lt.s32.totalorder %v513_v10, 0 }
  0x71   :  { %v440_v44 = vsel %vm514_vm9, 0, %v513_v10 }
  0x72   :  { %v441_v14 = vsub.s32 32, %v440_v44  ;;  %v442_v28 = vshll.u32 %v433_v2, %v440_v44  ;;  %v445_v20 = vsub.s32 4294967266, %v440_v44 }
  0x74   :  { %v443_v23 = vshrl.u32 %v425_v11, %v441_v14  ;;  %v446_v46 = vadd.s32 127, %v445_v20 }
  0x76   :  { %v549_v8 = vpop.eup %548  ;;  %v444_v25 = vor.u32 %v443_v23, %v442_v28  ;;  %v447_v26 = vshll.u32 %v446_v46, 23 }
  0x77   :  { %v551_v24 = vpop.eup %550  ;;  %v365_v58 = vxor.u32 2147483648, %v549_v8 }
  0x78   :  { %v362_v37 = vxor.u32 2147483648, %v551_v24  ;;  %v448_v27 = vor.u32 4788187, %v447_v26  ;;  %v451_v45 = vcvt.s32.f32 %v444_v25 }
  0x79   :  { %v366_v7 = vsel %vm364_vm10, %v365_v58, %v551_v24 }
  0x7a   :  { %v363_v22 = vsel %vm361_vm11, %v549_v8, %v362_v37  ;;  %v449_v21 = vand.u32 2147483647, %v448_v27 }
  0x7b   :  { %v367_v50 = vsel %vm360_vm12, %v363_v22, %v366_v7 }
  0x7c   :  { %v368_v55 = vsel %vm357_vm13, nan, %v367_v50  ;;  %v452_v47 = vmul.f32 %v451_v45, %v449_v21 }
  0x7d   :  { %v477_v34 = vmul.f32 %v907_v30, %v368_v55 }
  0x7e   :  { %v453_v36 = vxor.u32 2147483648, %v452_v47 }
  0x7f   :  { %481 = vst [vmem:[#allocation3 + $0x10] sm:$0xff] %v477_v34 }
  0x80   :  { %v454_v18 = vsel %vm371_vm14, %v453_v36, %v452_v47 }
  0x81   :  { %v457_v52 = vsel %vm370_vm15, %v711_v15, %v454_v18 }
  0x82   :  { %552 = vcosq.f32 %v457_v52 }
  0x83   :  { %554 = vsinq.f32 %v457_v52 }
  0x8c   :  { %v553_v54 = vpop.eup %552 }
  0x8d   :  { %v555_v32 = vpop.eup %554  ;;  %v469_v16 = vxor.u32 2147483648, %v553_v54 }
  0x8e   :  { %v466_v49 = vxor.u32 2147483648, %v555_v32 }
  0x8f   :  { %v470_v12 = vsel %vm468_vm0, %v469_v16, %v555_v32 }
  0x90   :  { %v467_v51 = vsel %vm465_vm1, %v553_v54, %v466_v49 }
  0x91   :  { %v471_v53 = vsel %vm464_vm2, %v467_v51, %v470_v12 }
  0x92   :  { %v472_v57 = vsel %vm461_vm3, nan, %v471_v53 }
  0x93   :  { %v478_v59 = vmul.f32 %v907_v30, %v472_v57 }
  0x95   :  { %482 = vst [vmem:[#allocation3 + $0x18] sm:$0xff] %v478_v59 }
  0x96   :  { %567 = shalt.err (!%p564_p4)
}
  0x97   :  { %s568_s20 = scalar_lea.hbm %s951_s3, 512 }
  0x98   :  { %p569_p5 = scmp.ne.s32.totalorder %s951_s3, %s568_s20  ;;  %p572_p6 = scmp.lt.u32.totalorder %s568_s20, %s951_s3 }
  0x9a   :  { %p574_p7 = pnand %p572_p6, %p569_p5 }
  0x9c   :  { %577 = shalt.err (!%p574_p7)
}
  0x9d   :  { %s587_s25 = smov 256   ;;  %s588_s26 = smov 16  }
  0x9e   :  { %494 = dma.vmem_to_hbm [thread:$0]  %s489_s16, 512, %s951_s3, [#allocation4], %s587_s25, %s587_s25, %s588_s26  }
  0x9f   :  { %578 = dma.done.wait [#allocation4], 512  }
  0xa0   :  { %579 = vsyncadd [#allocation4], 4294966784 }
  0xa1   :  { %498 = vsyncpa [#allocation4], 1 }

</bundles_post_ra>
